<compile_context>
chip_gen: v7x
topology: tpu7x:2x2x1
jax: 0.10.0
libtpu: 0.0.40
codegen_flags: <defaults>
</compile_context>

<pallas_src>
import math

import jax
import jax.numpy as jnp
from jax.experimental import pallas as pl
from jax.experimental.pallas import tpu as pltpu


def _round_up(x, m):
    return (x + m - 1) // m * m


def wide_and_deep_kernel(bias_ref,          # SMEM (1, 1) f32: global_bias + b4
                         wide_ref,          # (TB, 1)  f32: precomputed wide sum
                         emb_ref,           # (TB, FD) compute dtype
                         w1_ref, b1_ref,    # (FD, Hp) cdt / (1, Hp) f32
                         w2_ref, b2_ref,    # (Hp, Hp) cdt / (1, Hp) f32
                         w3_ref, b3_ref,    # (Hp, Hp) cdt / (1, Hp) f32
                         w4t_ref,           # (1, Hp)  f32 (w4^T, zero-padded)
                         out_ref):          # (TB, 1)  f32
    cdt = emb_ref.dtype

    # Deep MLP.  Matmul inputs may be bf16; accumulation is always f32 via
    # preferred_element_type; the bias-add + ReLU epilogue stays in f32
    # (v5e has no bf16 VPU path).  Hidden dim is zero-padded 300 -> 384 so all
    # epilogue vregs are full; zeros flow through ReLU and contribute 0
    # downstream, so the math is bit-identical to the unpadded model.
    # nn.Dropout(p=0.2) is identity in eval mode (no-op here).
    h = jnp.dot(emb_ref[...], w1_ref[...], preferred_element_type=jnp.float32)
    h = jnp.maximum(h + b1_ref[...], 0.0)
    h = jnp.dot(h.astype(cdt), w2_ref[...], preferred_element_type=jnp.float32)
    h = jnp.maximum(h + b2_ref[...], 0.0)
    h = jnp.dot(h.astype(cdt), w3_ref[...], preferred_element_type=jnp.float32)
    h = jnp.maximum(h + b3_ref[...], 0.0)

    # Final (Hp -> 1) layer: VPU multiply + lane-reduce instead of an N=1 MXU
    # matmul (which would use 1/256 of the MXU lanes).
    deep = jnp.sum(h * w4t_ref[...], axis=-1, keepdims=True)     # (TB, 1) f32

    logit = bias_ref[0, 0] + wide_ref[...] + deep                 # (TB, 1)
    out_ref[...] = jax.nn.sigmoid(logit)


def wide_and_deep_forward(x, params, *, block_b=1024, compute_dtype=jnp.bfloat16):
    """x: int32 (batch, field_nums) feature indices -> (batch, 1) pctr."""
    B, F = x.shape
    D = params["embedding"].shape[1]
    fd = F * D
    H = params["w1"].shape[1]
    Hp = _round_up(H, 128)            # 300 -> 384: full-vreg epilogues
    cdt = compute_dtype

    # Pad only the tiny index array (<= 7 rows, index 0) so the gathered
    # activation is produced at a sublane-aligned row count directly -- no
    # jnp.pad copy of the big (B, F*D) activation.
    b_pad = _round_up(B, 8)
    if b_pad != B:
        x = jnp.pad(x, ((0, b_pad - B), (0, 0)))

    # Wide part pre-reduced in the wrapper (XLA fuses the reduce into the
    # gather): (b_pad, 1) instead of a lane-sparse (b_pad, F) kernel input.
    wide = jnp.sum(params["linear_emb"][x], axis=1).astype(jnp.float32)

    # Deep input gathered directly in the compute dtype: a single HBM pass
    # over the (b_pad, F*D) activation (no separate f32 gather + bf16 cast).
    emb_flat = params["embedding"].astype(cdt)[x].reshape(b_pad, fd)

    # Zero-pad hidden dim to Hp; zeros are exact pass-throughs.
    def pad2(a, r, c):
        return jnp.pad(a, ((0, r - a.shape[0]), (0, c - a.shape[1])))

    w1 = pad2(params["w1"], fd, Hp).astype(cdt)
    w2 = pad2(params["w2"], Hp, Hp).astype(cdt)
    w3 = pad2(params["w3"], Hp, Hp).astype(cdt)
    b1 = pad2(params["b1"], 1, Hp).astype(jnp.float32)
    b2 = pad2(params["b2"], 1, Hp).astype(jnp.float32)
    b3 = pad2(params["b3"], 1, Hp).astype(jnp.float32)
    w4t = pad2(params["w4"].reshape(1, H), 1, Hp).astype(jnp.float32)
    # Fold global_bias + b4 into one scalar passed through SMEM.
    out_bias = (params["global_bias"] + params["b4"]).reshape(1, 1).astype(jnp.float32)

    # Large batch tile: amortizes per-grid-step overhead; footprint at tb=1024
    # (even tb=2048) stays well inside the 32 MiB scoped-VMEM limit requested
    # below, so it is safe on v5e/v6e/v7x alike.
    tb = min(block_b, b_pad)
    grid = (pl.cdiv(b_pad, tb),)      # ragged last block handled by Pallas

    def resident(shape):              # constant index_map -> stays in VMEM
        return pl.BlockSpec(shape, lambda i: (0, 0))

    out = pl.pallas_call(
        wide_and_deep_kernel,
        out_shape=jax.ShapeDtypeStruct((b_pad, 1), jnp.float32),
        grid=grid,
        in_specs=[
            pl.BlockSpec(memory_space=pltpu.MemorySpace.SMEM),    # folded bias
            pl.BlockSpec((tb, 1), lambda i: (i, 0)),              # wide tile
            pl.BlockSpec((tb, fd), lambda i: (i, 0)),             # emb tile
            resident((fd, Hp)), resident((1, Hp)),                # w1, b1
            resident((Hp, Hp)), resident((1, Hp)),                # w2, b2
            resident((Hp, Hp)), resident((1, Hp)),                # w3, b3
            resident((1, Hp)),                                    # w4^T
        ],
        out_specs=pl.BlockSpec((tb, 1), lambda i: (i, 0)),
        compiler_params=pltpu.CompilerParams(
            dimension_semantics=("parallel",),        # megacore split on v7x
            vmem_limit_bytes=32 * 1024 * 1024,        # v5e default is 16 MiB
        ),
    )(out_bias, wide, emb_flat, w1, b1, w2, b2, w3, b3, w4t)

    return out[:B]


def init_params(key, feature_nums, field_nums, latent_dims):
    """Deterministic parameter init mirroring the PyTorch __init__."""
    ks = jax.random.split(key, 8)
    deep_in = field_nums * latent_dims
    h = 300

    # nn.Embedding default init: N(0, 1)
    linear_emb = jax.random.normal(ks[0], (feature_nums, 1), jnp.float32)

    # xavier_uniform_ for the embedding table
    bound_e = math.sqrt(6.0 / (feature_nums + latent_dims))
    embedding = jax.random.uniform(ks[1], (feature_nums, latent_dims),
                                   jnp.float32, -bound_e, bound_e)

    # Linear layers: uniform(-1/sqrt(fan_in), 1/sqrt(fan_in)), bias = 0
    def lin_w(k, fan_in, fan_out):
        y = 1.0 / math.sqrt(fan_in)
        return jax.random.uniform(k, (fan_in, fan_out), jnp.float32, -y, y)

    params = {
        "linear_emb": linear_emb,
        "embedding": embedding,
        "global_bias": jnp.zeros((1, 1), jnp.float32),
        "w1": lin_w(ks[2], deep_in, h), "b1": jnp.zeros((1, h), jnp.float32),
        "w2": lin_w(ks[3], h, h),       "b2": jnp.zeros((1, h), jnp.float32),
        "w3": lin_w(ks[4], h, h),       "b3": jnp.zeros((1, h), jnp.float32),
        "w4": lin_w(ks[5], h, 1),       "b4": jnp.zeros((1, 1), jnp.float32),
    }
    return params


def wide_and_deep_reference(x, params):
    """Pure-JAX f32 reference (eval mode, dropout = identity)."""
    lin = params["linear_emb"][x]            # (B, F, 1)
    emb = params["embedding"][x]             # (B, F, D)
    B = x.shape[0]
    wide = jnp.sum(lin, axis=1)              # (B, 1)
    h = emb.reshape(B, -1)
    h = jnp.maximum(h @ params["w1"] + params["b1"], 0.0)
    h = jnp.maximum(h @ params["w2"] + params["b2"], 0.0)
    h = jnp.maximum(h @ params["w3"] + params["b3"], 0.0)
    deep = h @ params["w4"] + params["b4"]
    return jax.nn.sigmoid(params["global_bias"] + wide + deep)


if __name__ == "__main__":
    feature_nums, field_nums, latent_dims = 100, 8, 8
    batch = 4

    key = jax.random.PRNGKey(0)
    k_params, k_x = jax.random.split(key)
    params = init_params(k_params, feature_nums, field_nums, latent_dims)

    x = jax.random.randint(k_x, (batch, field_nums), 0, feature_nums,
                           dtype=jnp.int32)

    ref = wide_and_deep_reference(x, params)

    # f32 matmul path: matches the reference tightly (padding is exact).
    out_f32 = jax.block_until_ready(
        wide_and_deep_forward(x, params, compute_dtype=jnp.float32))
    assert out_f32.shape == (batch, 1)
    assert jnp.allclose(out_f32, ref, rtol=1e-5, atol=1e-5)

    # bf16 matmul path (f32 accumulation) -- the fast path on v6e/v7x.
    out_bf16 = jax.block_until_ready(
        wide_and_deep_forward(x, params, compute_dtype=jnp.bfloat16))
    assert out_bf16.shape == (batch, 1)
    assert jnp.allclose(out_bf16, ref, rtol=5e-2, atol=5e-2)

    print("KERNEL_OK")
</pallas_src>

<mosaic_0001>
module attributes {stable_mosaic.version = 11 : i64} {
  func.func @wide_and_deep_kernel(%arg0: i32, %arg1: memref<1x1xf32, #tpu.memory_space<smem>>, %arg2: memref<8x1xf32, #tpu.memory_space<vmem>>, %arg3: memref<8x64xf32, #tpu.memory_space<vmem>>, %arg4: memref<64x384xf32, #tpu.memory_space<vmem>>, %arg5: memref<1x384xf32, #tpu.memory_space<vmem>>, %arg6: memref<384x384xf32, #tpu.memory_space<vmem>>, %arg7: memref<1x384xf32, #tpu.memory_space<vmem>>, %arg8: memref<384x384xf32, #tpu.memory_space<vmem>>, %arg9: memref<1x384xf32, #tpu.memory_space<vmem>>, %arg10: memref<1x384xf32, #tpu.memory_space<vmem>>, %arg11: memref<8x1xf32, #tpu.memory_space<vmem>>) attributes {dimension_semantics = [#tpu.dimension_semantics<parallel>], iteration_bounds = array<i64: 1>, scalar_prefetch = 0 : i64, scratch_operands = 0 : i64, tpu.core_type = #tpu.core_type<tc>, window_params = [{transform_indices = @transform_0, window_bounds = array<i64: 1, 1>}, {transform_indices = @transform_1, window_bounds = array<i64: 8, 1>}, {transform_indices = @transform_2, window_bounds = array<i64: 8, 64>}, {pipeline_mode = #tpu.pipeline_mode<synchronous>, transform_indices = @transform_3, window_bounds = array<i64: 64, 384>}, {pipeline_mode = #tpu.pipeline_mode<synchronous>, transform_indices = @transform_4, window_bounds = array<i64: 1, 384>}, {pipeline_mode = #tpu.pipeline_mode<synchronous>, transform_indices = @transform_5, window_bounds = array<i64: 384, 384>}, {pipeline_mode = #tpu.pipeline_mode<synchronous>, transform_indices = @transform_6, window_bounds = array<i64: 1, 384>}, {pipeline_mode = #tpu.pipeline_mode<synchronous>, transform_indices = @transform_7, window_bounds = array<i64: 384, 384>}, {pipeline_mode = #tpu.pipeline_mode<synchronous>, transform_indices = @transform_8, window_bounds = array<i64: 1, 384>}, {pipeline_mode = #tpu.pipeline_mode<synchronous>, transform_indices = @transform_9, window_bounds = array<i64: 1, 384>}, {transform_indices = @transform_10, window_bounds = array<i64: 8, 1>}]} {
    %c0 = arith.constant 0 : index
    %c0_0 = arith.constant 0 : index
    %0 = vector.load %arg3[%c0, %c0_0] : memref<8x64xf32, #tpu.memory_space<vmem>>, vector<8x64xf32>
    %c0_1 = arith.constant 0 : index
    %c0_2 = arith.constant 0 : index
    %1 = vector.load %arg4[%c0_1, %c0_2] : memref<64x384xf32, #tpu.memory_space<vmem>>, vector<64x384xf32>
    %cst = arith.constant dense<0.000000e+00> : vector<8x384xf32>
    %2 = tpu.matmul %0, %1, %cst {dimension_numbers = #tpu.dot_dimension_numbers<[1], [0], [0], [1], [0, 0, 1, 1], [], []>} : vector<8x64xf32>, vector<64x384xf32>, vector<8x384xf32> -> vector<8x384xf32>
    %c0_3 = arith.constant 0 : index
    %c0_4 = arith.constant 0 : index
    %3 = vector.load %arg5[%c0_3, %c0_4] : memref<1x384xf32, #tpu.memory_space<vmem>>, vector<1x384xf32>
    %4 = vector.broadcast %3 : vector<1x384xf32> to vector<8x384xf32>
    %5 = arith.addf %2, %4 : vector<8x384xf32>
    %cst_5 = arith.constant 0.000000e+00 : f32
    %6 = vector.broadcast %cst_5 : f32 to vector<8x384xf32>
    %7 = arith.maximumf %5, %6 : vector<8x384xf32>
    %c0_6 = arith.constant 0 : index
    %c0_7 = arith.constant 0 : index
    %8 = vector.load %arg6[%c0_6, %c0_7] : memref<384x384xf32, #tpu.memory_space<vmem>>, vector<384x384xf32>
    %cst_8 = arith.constant dense<0.000000e+00> : vector<8x384xf32>
    %9 = tpu.matmul %7, %8, %cst_8 {dimension_numbers = #tpu.dot_dimension_numbers<[1], [0], [0], [1], [0, 0, 1, 1], [], []>} : vector<8x384xf32>, vector<384x384xf32>, vector<8x384xf32> -> vector<8x384xf32>
    %c0_9 = arith.constant 0 : index
    %c0_10 = arith.constant 0 : index
    %10 = vector.load %arg7[%c0_9, %c0_10] : memref<1x384xf32, #tpu.memory_space<vmem>>, vector<1x384xf32>
    %11 = vector.broadcast %10 : vector<1x384xf32> to vector<8x384xf32>
    %12 = arith.addf %9, %11 : vector<8x384xf32>
    %cst_11 = arith.constant 0.000000e+00 : f32
    %13 = vector.broadcast %cst_11 : f32 to vector<8x384xf32>
    %14 = arith.maximumf %12, %13 : vector<8x384xf32>
    %c0_12 = arith.constant 0 : index
    %c0_13 = arith.constant 0 : index
    %15 = vector.load %arg8[%c0_12, %c0_13] : memref<384x384xf32, #tpu.memory_space<vmem>>, vector<384x384xf32>
    %cst_14 = arith.constant dense<0.000000e+00> : vector<8x384xf32>
    %16 = tpu.matmul %14, %15, %cst_14 {dimension_numbers = #tpu.dot_dimension_numbers<[1], [0], [0], [1], [0, 0, 1, 1], [], []>} : vector<8x384xf32>, vector<384x384xf32>, vector<8x384xf32> -> vector<8x384xf32>
    %c0_15 = arith.constant 0 : index
    %c0_16 = arith.constant 0 : index
    %17 = vector.load %arg9[%c0_15, %c0_16] : memref<1x384xf32, #tpu.memory_space<vmem>>, vector<1x384xf32>
    %18 = vector.broadcast %17 : vector<1x384xf32> to vector<8x384xf32>
    %19 = arith.addf %16, %18 : vector<8x384xf32>
    %cst_17 = arith.constant 0.000000e+00 : f32
    %20 = vector.broadcast %cst_17 : f32 to vector<8x384xf32>
    %21 = arith.maximumf %19, %20 : vector<8x384xf32>
    %c0_18 = arith.constant 0 : index
    %c0_19 = arith.constant 0 : index
    %22 = vector.load %arg10[%c0_18, %c0_19] : memref<1x384xf32, #tpu.memory_space<vmem>>, vector<1x384xf32>
    %23 = vector.broadcast %22 : vector<1x384xf32> to vector<8x384xf32>
    %24 = arith.mulf %21, %23 : vector<8x384xf32>
    %cst_20 = arith.constant dense<0.000000e+00> : vector<8xf32>
    %25 = vector.multi_reduction <add>, %24, %cst_20 [1] : vector<8x384xf32> to vector<8xf32>
    %26 = vector.shape_cast %25 : vector<8xf32> to vector<8x1xf32>
    %c0_21 = arith.constant 0 : index
    %c0_22 = arith.constant 0 : index
    %27 = memref.load %arg1[%c0_21, %c0_22] : memref<1x1xf32, #tpu.memory_space<smem>>
    %c0_23 = arith.constant 0 : index
    %c0_24 = arith.constant 0 : index
    %28 = vector.load %arg2[%c0_23, %c0_24] : memref<8x1xf32, #tpu.memory_space<vmem>>, vector<8x1xf32>
    %29 = vector.broadcast %27 : f32 to vector<8x1xf32>
    %30 = arith.addf %29, %28 : vector<8x1xf32>
    %31 = arith.addf %30, %26 : vector<8x1xf32>
    %32 = arith.negf %31 : vector<8x1xf32>
    %33 = math.exp %32 : vector<8x1xf32>
    %cst_25 = arith.constant 1.000000e+00 : f32
    %34 = vector.broadcast %cst_25 : f32 to vector<8x1xf32>
    %35 = arith.addf %34, %33 : vector<8x1xf32>
    %36 = arith.divf %34, %35 : vector<8x1xf32>
    %c0_26 = arith.constant 0 : index
    %c0_27 = arith.constant 0 : index
    %37 = vector.load %arg11[%c0_26, %c0_27] : memref<8x1xf32, #tpu.memory_space<vmem>>, vector<8x1xf32>
    tpu.vector_store %arg11[%c0_26, %c0_27], %36 {strides = array<i32>} : memref<8x1xf32, #tpu.memory_space<vmem>>, vector<8x1xf32>,
    return
  }
  func.func @transform_0(%arg0: i32) -> (i32, i32) {
    %c0_i32 = arith.constant 0 : i32
    %c0_i32_0 = arith.constant 0 : i32
    %c0_i32_1 = arith.constant 0 : i32
    return %c0_i32, %c0_i32_0 : i32, i32
  }
  func.func @transform_1(%arg0: i32) -> (i32, i32) {
    %c0_i32 = arith.constant 0 : i32
    %c0_i32_0 = arith.constant 0 : i32
    return %arg0, %c0_i32 : i32, i32
  }
  func.func @transform_2(%arg0: i32) -> (i32, i32) {
    %c0_i32 = arith.constant 0 : i32
    %c0_i32_0 = arith.constant 0 : i32
    return %arg0, %c0_i32 : i32, i32
  }
  func.func @transform_3(%arg0: i32) -> (i32, i32) {
    %c0_i32 = arith.constant 0 : i32
    %c0_i32_0 = arith.constant 0 : i32
    %c0_i32_1 = arith.constant 0 : i32
    return %c0_i32, %c0_i32_0 : i32, i32
  }
  func.func @transform_4(%arg0: i32) -> (i32, i32) {
    %c0_i32 = arith.constant 0 : i32
    %c0_i32_0 = arith.constant 0 : i32
    %c0_i32_1 = arith.constant 0 : i32
    return %c0_i32, %c0_i32_0 : i32, i32
  }
  func.func @transform_5(%arg0: i32) -> (i32, i32) {
    %c0_i32 = arith.constant 0 : i32
    %c0_i32_0 = arith.constant 0 : i32
    %c0_i32_1 = arith.constant 0 : i32
    return %c0_i32, %c0_i32_0 : i32, i32
  }
  func.func @transform_6(%arg0: i32) -> (i32, i32) {
    %c0_i32 = arith.constant 0 : i32
    %c0_i32_0 = arith.constant 0 : i32
    %c0_i32_1 = arith.constant 0 : i32
    return %c0_i32, %c0_i32_0 : i32, i32
  }
  func.func @transform_7(%arg0: i32) -> (i32, i32) {
    %c0_i32 = arith.constant 0 : i32
    %c0_i32_0 = arith.constant 0 : i32
    %c0_i32_1 = arith.constant 0 : i32
    return %c0_i32, %c0_i32_0 : i32, i32
  }
  func.func @transform_8(%arg0: i32) -> (i32, i32) {
    %c0_i32 = arith.constant 0 : i32
    %c0_i32_0 = arith.constant 0 : i32
    %c0_i32_1 = arith.constant 0 : i32
    return %c0_i32, %c0_i32_0 : i32, i32
  }
  func.func @transform_9(%arg0: i32) -> (i32, i32) {
    %c0_i32 = arith.constant 0 : i32
    %c0_i32_0 = arith.constant 0 : i32
    %c0_i32_1 = arith.constant 0 : i32
    return %c0_i32, %c0_i32_0 : i32, i32
  }
  func.func @transform_10(%arg0: i32) -> (i32, i32) {
    %c0_i32 = arith.constant 0 : i32
    %c0_i32_0 = arith.constant 0 : i32
    return %arg0, %c0_i32 : i32, i32
  }
}

</mosaic_0001>

<bundles_post_ra>
// kernel: tpu_custom_call.1
= control target key start
LH: loop header
LB: loop body
LE: loop exit
PB: predicated region body
PF: predicated region fallthrough
CT: control target
= control target key end

     0   :  { %16 = vsyncpa [#allocation4], 0  ;;  %s2033_s0 = inlined_call_operand.<no memory space> [shape: f32[1,1], index: 0, kind: input, shape index: {}]   ;;  %s2034_s1 = inlined_call_operand.vmem [shape: f32[8,1], index: 1, kind: input, shape index: {}]   ;;  %s2035_s2 = inlined_call_operand.vmem [shape: f32[8,64], index: 2, kind: input, shape index: {}]   ;;  %s2036_s3 = inlined_call_operand.hbm [shape: f32[64,384], index: 3, kind: input, shape index: {}]   ;;  %s2037_s4 = inlined_call_operand.vmem [shape: f32[1,384], index: 4, kind: input, shape index: {}]   ;;  %s2038_s5 = inlined_call_operand.hbm [shape: f32[384,384], index: 5, kind: input, shape index: {}]   ;;  %s2039_s6 = inlined_call_operand.vmem [shape: f32[1,384], index: 6, kind: input, shape index: {}]   ;;  %s2040_s7 = inlined_call_operand.hbm [shape: f32[384,384], index: 7, kind: input, shape index: {}]   ;;  %s2041_s8 = inlined_call_operand.vmem [shape: f32[1,384], index: 8, kind: input, shape index: {}]   ;;  %s2042_s9 = inlined_call_operand.vmem [shape: f32[1,384], index: 9, kind: input, shape index: {}]   ;;  %s2043_s10 = inlined_call_operand.vmem [shape: f32[8,1], index: 10, kind: output, shape index: {}]  }
   0x1   :  { %17 = vsyncpa [#allocation6], 0  ;;  %s1829_s13 = smov [#allocation5]   ;;  %s1830_s15 = smov [#allocation3]  }
   0x2   :  { %s43_s14 = sshll.u32 %s1829_s13, 4  ;;  %s29_s16 = sshll.u32 %s1830_s15, 4  ;;  %s44_s14 = int_to_ptr.vmem [resolvable:$true] %s43_s14  ;;  %s1892_s16 = int_to_ptr.vmem [resolvable:$true] %s29_s16 }
   0x3   :  { %s1759_s19 = scalar_lea.hbm %s2038_s5, 18432 }
   0x4   :  { %p1760_p0 = scmp.ne.s32.totalorder %s2038_s5, %s1759_s19  ;;  %p1763_p1 = scmp.lt.u32.totalorder %s1759_s19, %s2038_s5 }
   0x6   :  { %p1765_p2 = pnand %p1763_p1, %p1760_p0 }
   0x8   :  { %1768 = shalt.err (!%p1765_p2)
}
   0x9   :  { %s1769_s24 = scalar_lea.vmem %s44_s14, 18432  ;;  %p1774_p4 = scmp.lt.s32.totalorder %s44_s14, %s44_s14 }
   0xa   :  { %p1770_p3 = scmp.ne.s32.totalorder %s44_s14, %s1769_s24  ;;  %p1775_p5 = scmp.lt.s32.totalorder %s1769_s24, %s1769_s24 }
   0xc   :  { %p1776_p6 = por %p1775_p5, %p1774_p4 }
   0xe   :  { %p1777_p7 = pnand %p1776_p6, %p1770_p3 }
  0x10   :  { %1780 = shalt.err (!%p1777_p7)
}
  0x11   :  { %s1831_s25 = smov 384   ;;  %s1832_s26 = smov 24  }
  0x12   :  { %49 = dma.hbm_to_vmem [thread:$0]  %s2038_s5, 18432, %s44_s14, [#allocation6], %s1831_s25, %s1831_s25, %s1832_s26  }
  0x13   :  { %s1781_s11 = scalar_lea.hbm %s2036_s3, 3072 }
  0x14   :  { %p1782_p8 = scmp.ne.s32.totalorder %s2036_s3, %s1781_s11  ;;  %p1785_p9 = scmp.lt.u32.totalorder %s1781_s11, %s2036_s3 }
  0x16   :  { %p1787_p10 = pnand %p1785_p9, %p1782_p8 }
  0x18   :  { %1790 = shalt.err (!%p1787_p10)
}
  0x19   :  { %s1791_s18 = scalar_lea.vmem %s1892_s16, 3072  ;;  %p1796_p12 = scmp.lt.s32.totalorder %s1892_s16, %s1892_s16 }
  0x1a   :  { %p1792_p11 = scmp.ne.s32.totalorder %s1892_s16, %s1791_s18  ;;  %p1797_p13 = scmp.lt.s32.totalorder %s1791_s18, %s1791_s18 }
  0x1c   :  { %p1798_p0 = por %p1797_p13, %p1796_p12 }
  0x1e   :  { %p1799_p1 = pnand %p1798_p0, %p1792_p11 }
  0x20   :  { %1802 = shalt.err (!%p1799_p1)
}
  0x21   :  { %35 = dma.hbm_to_vmem [thread:$0]  %s2036_s3, 3072, %s1892_s16, [#allocation4], %s1831_s25, %s1831_s25, %s1832_s26  }
  0x22   :  { %s1833_s19 = smov [#allocation7]   ;;  %s1803_s23 = scalar_lea.hbm %s2040_s7, 18432 }
  0x23   :  { %s57_s20 = sshll.u32 %s1833_s19, 4  ;;  %p1804_p2 = scmp.ne.s32.totalorder %s2040_s7, %s1803_s23  ;;  %s58_s20 = int_to_ptr.vmem [resolvable:$true] %s57_s20 }
  0x24   :  { %p1807_p3 = scmp.lt.u32.totalorder %s1803_s23, %s2040_s7 }
  0x26   :  { %p1809_p4 = pnand %p1807_p3, %p1804_p2 }
  0x28   :  { %1812 = shalt.err (!%p1809_p4)
}
  0x29   :  { %s1813_s30 = scalar_lea.vmem %s58_s20, 18432  ;;  %p1818_p6 = scmp.lt.s32.totalorder %s58_s20, %s58_s20 }
  0x2a   :  { %p1814_p5 = scmp.ne.s32.totalorder %s58_s20, %s1813_s30  ;;  %p1819_p7 = scmp.lt.s32.totalorder %s1813_s30, %s1813_s30 }
  0x2c   :  { %p1820_p8 = por %p1819_p7, %p1818_p6 }
  0x2e   :  { %p1821_p9 = pnand %p1820_p8, %p1814_p5 }
  0x30   :  { %1824 = shalt.err (!%p1821_p9)
}
  0x31   :  { %63 = dma.hbm_to_vmem [thread:$0]  %s2040_s7, 18432, %s58_s20, [#allocation6], %s1831_s25, %s1831_s25, %s1832_s26  }
  0x32   :  { %1825 = dma.done.wait [#allocation4], 3072  }
  0x33   :  { %1826 = vsyncadd [#allocation4], 4294964224 }
  0x34   :  { %1827 = dma.done.wait [#allocation6], 36864  }
  0x35   :  { %1828 = vsyncadd [#allocation6], 4294930432  ;;  %v1834_v0 = vmov 0.0   ;;  %v1835_v1 = vmov 0.0|0.0   ;;  %vm1836_vm0 = vmmov 0   ;;  %v79_v2 = vld [vmem:[#allocation3 + $0x8] sm:$0xff] }
  0x36   :  { %187 = vmatprep.mubr.f32.mxu0 %v1834_v0  ;;  %1423 = vmatprep.subr.bf16.mxu1 %v1835_v1  ;;  %v82_v3 = vld [vmem:[#allocation3 + $0x20] sm:$0xff]  ;;  %v81_v6 = vld [vmem:[#allocation3 + $0x18] sm:$0xff]  ;;  %v88_v8 = vld [vmem:[#allocation3 + $0x50] sm:$0xff]  ;;  %vm119_vm1 = vcmask 523264   ;;  %vm1194_vm2 = vcmask 7168  }
  0x37   :  { %1334 = vmatprep.mubr.msk.f32.mxu1 %vm1836_vm0, %v1834_v0  ;;  %v78_v4 = vld [vmem:[#allocation3] sm:$0xff]  ;;  %v1407_v5 = vpack.c.bf16 %v82_v3, %v79_v2  ;;  %v85_v7 = vld [vmem:[#allocation3 + $0x38] sm:$0xff]  ;;  %v84_v11 = vld [vmem:[#allocation3 + $0x30] sm:$0xff] }
  0x38   :  { %v1409_v9 = vpack.c.bf16 %v81_v6, %v78_v4  ;;  %v1411_v10 = vpack.c.bf16 %v88_v8, %v85_v7  ;;  %v87_v12 = vld [vmem:[#allocation3 + $0x48] sm:$0xff]  ;;  %v94_v14 = vld [vmem:[#allocation3 + $0x80] sm:$0xff]  ;;  %v93_v17 = vld [vmem:[#allocation3 + $0x78] sm:$0xff] }
  0x39   :  { %v91_v13 = vld [vmem:[#allocation3 + $0x68] sm:$0xff]  ;;  %1408 = vmatprep.subr.bf16.mxu0 %v1407_v5  ;;  %v1413_v15 = vpack.c.bf16 %v87_v12, %v84_v11  ;;  %v90_v16 = vld [vmem:[#allocation3 + $0x60] sm:$0xff]  ;;  %v97_v19 = vld [vmem:[#allocation3 + $0x98] sm:$0xff] }
  0x3a   :  { %1410 = vmatpush1.bf16.msra.mxu0 %v1409_v9  ;;  %v1415_v18 = vpack.c.bf16 %v94_v14, %v91_v13  ;;  %v100_v20 = vld [vmem:[#allocation3 + $0xb0] sm:$0xff]  ;;  %v83_v22 = vld [vmem:[#allocation3 + $0x28] sm:$0xff]  ;;  %v86_v23 = vld [vmem:[#allocation3 + $0x40] sm:$0xff]  ;;  %v1417_v26 = vpack.c.bf16 %v93_v17, %v90_v16 }
  0x3b   :  { %1412 = vmatprep.subr.bf16.mxu0 %v1411_v10  ;;  %v80_v21 = vld [vmem:[#allocation3 + $0x10] sm:$0xff]  ;;  %v89_v24 = vld [vmem:[#allocation3 + $0x58] sm:$0xff]  ;;  %v1419_v27 = vpack.c.bf16 %v100_v20, %v97_v19  ;;  %v99_v29 = vld [vmem:[#allocation3 + $0xa8] sm:$0xff] }
  0x3c   :  { %v1424_v25 = vpack.c.bf16 %v83_v22, %v80_v21  ;;  %v96_v28 = vld [vmem:[#allocation3 + $0x90] sm:$0xff]  ;;  %v1427_v30 = vpack.c.bf16 %v89_v24, %v86_v23  ;;  %v95_v32 = vld [vmem:[#allocation3 + $0x88] sm:$0xff]  ;;  %v271_v34 = vld [vmem:[#allocation5 + $0x20] sm:$0xff] }
  0x3d   :  { %v92_v31 = vld [vmem:[#allocation3 + $0x70] sm:$0xff]  ;;  %v268_v33 = vld [vmem:[#allocation5 + $0x8] sm:$0xff]  ;;  %v1421_v35 = vpack.c.bf16 %v99_v29, %v96_v28  ;;  %v98_v37 = vld [vmem:[#allocation3 + $0xa0] sm:$0xff] }
  0x3e   :  { %1414 = vmatpush1.bf16.msra.mxu0 %v1413_v15  ;;  %1425 = vmatpush3.bf16.msra.mxu1 %v1424_v25  ;;  %v1430_v36 = vpack.c.bf16 %v95_v32, %v92_v31  ;;  %v1435_v38 = vpack.c.bf16 %v271_v34, %v268_v33  ;;  %v267_v39 = vld [vmem:[#allocation5] sm:$0xff]  ;;  %v270_v40 = vld [vmem:[#allocation5 + $0x18] sm:$0xff]  ;;  %v277_v43 = vld [vmem:[#allocation5 + $0x50] sm:$0xff] }
  0x3f   :  { %1416 = vmatprep.subr.bf16.mxu0 %v1415_v18  ;;  %1426 = vmatprep.subr.bf16.mxu1 %v1835_v1  ;;  %v101_v41 = vld [vmem:[#allocation3 + $0xb8] sm:$0xff]  ;;  %v77_v44 = vld [vmem:[%s2035_s2] sm:$0xff]  ;;  %v1437_v45 = vpack.c.bf16 %v270_v40, %v267_v39  ;;  %v273_v48 = vld [vmem:[#allocation5 + $0x30] sm:$0xff] }
  0x40   :  { %v274_v42 = vld [vmem:[#allocation5 + $0x38] sm:$0xff]  ;;  %v1433_v46 = vpack.c.bf16 %v101_v41, %v98_v37  ;;  %v276_v49 = vld [vmem:[#allocation5 + $0x48] sm:$0xff]  ;;  %v283_v51 = vld [vmem:[#allocation5 + $0x80] sm:$0xff] }
  0x41   :  { %v1439_v47 = vpack.c.bf16 %v277_v43, %v274_v42  ;;  %v280_v50 = vld [vmem:[#allocation5 + $0x68] sm:$0xff]  ;;  %v317_v52 = vld [vmem:[#allocation5 + $0x190] sm:$0xff]  ;;  %v1441_v53 = vpack.c.bf16 %v276_v49, %v273_v48  ;;  %v279_v54 = vld [vmem:[#allocation5 + $0x60] sm:$0xff] }
  0x42   :  { %1418 = vmatpush1.bf16.msra.mxu0 %v1417_v26  ;;  %1428 = vmatpush3.bf16.msra.mxu1 %v1427_v30  ;;  %v282_v55 = vld [vmem:[#allocation5 + $0x78] sm:$0xff]  ;;  %v320_v56 = vld [vmem:[#allocation5 + $0x1a8] sm:$0xff]  ;;  %v1443_v57 = vpack.c.bf16 %v283_v51, %v280_v50  ;;  %v269_v60 = vld [vmem:[#allocation5 + $0x10] sm:$0xff] }
  0x43   :  { %1420 = vmatprep.subr.bf16.mxu0 %v1419_v27  ;;  %1429 = vmatprep.subr.bf16.mxu1 %v1835_v1  ;;  %v286_v58 = vld [vmem:[#allocation5 + $0x98] sm:$0xff]  ;;  %v1531_v59 = vpack.c.bf16 %v320_v56, %v317_v52  ;;  %v272_v61 = vld [vmem:[#allocation5 + $0x28] sm:$0xff]  ;;  %v289_v62 = vld [vmem:[#allocation5 + $0xb0] sm:$0xff]  ;;  %v1445_v6 = vpack.c.bf16 %v282_v55, %v279_v54 }
  0x44   :  { %v1533_v63 = vpack.c.bf16 %v272_v61, %v269_v60  ;;  %v323_v2 = vld [vmem:[#allocation5 + $0x1c0] sm:$0xff]  ;;  %v326_v3 = vld [vmem:[#allocation5 + $0x1d8] sm:$0xff]  ;;  %v285_v7 = vld [vmem:[#allocation5 + $0x90] sm:$0xff]  ;;  %v1447_v10 = vpack.c.bf16 %v289_v62, %v286_v58 }
  0x45   :  { %v1535_v4 = vpack.c.bf16 %v326_v3, %v323_v2  ;;  %v275_v5 = vld [vmem:[#allocation5 + $0x40] sm:$0xff]  ;;  %v288_v8 = vld [vmem:[#allocation5 + $0xa8] sm:$0xff]  ;;  %v278_v9 = vld [vmem:[#allocation5 + $0x58] sm:$0xff] }
  0x46   :  { %1422 = vmatpush1.bf16.msra.mxu0 %v1421_v35  ;;  %1431 = vmatpush3.bf16.msra.mxu1 %v1430_v36  ;;  %v292_v11 = vld [vmem:[#allocation5 + $0xc8] sm:$0xff]  ;;  %v1537_v12 = vpack.c.bf16 %v278_v9, %v275_v5  ;;  %v329_v13 = vld [vmem:[#allocation5 + $0x1f0] sm:$0xff]  ;;  %v295_v15 = vld [vmem:[#allocation5 + $0xe0] sm:$0xff]  ;;  %v1449_v20 = vpack.c.bf16 %v288_v8, %v285_v7 }
  0x47   :  { %1436 = vmatprep.subr.bf16.mxu0 %v1435_v38  ;;  %1432 = vmatprep.subr.bf16.mxu1 %v1835_v1  ;;  %v332_v14 = vld [vmem:[#allocation5 + $0x208] sm:$0xff]  ;;  %v281_v17 = vld [vmem:[#allocation5 + $0x70] sm:$0xff]  ;;  %v335_v19 = vld [vmem:[#allocation5 + $0x220] sm:$0xff]  ;;  %v1451_v22 = vpack.c.bf16 %v295_v15, %v292_v11 }
  0x48   :  { %v1539_v16 = vpack.c.bf16 %v332_v14, %v329_v13  ;;  %v284_v18 = vld [vmem:[#allocation5 + $0x88] sm:$0xff]  ;;  %v338_v21 = vld [vmem:[#allocation5 + $0x238] sm:$0xff]  ;;  %v291_v23 = vld [vmem:[#allocation5 + $0xc0] sm:$0xff] }
  0x49   :  { %1202 = vmatmul.mubr.msk.f32.vlgmr.msra.gmra.mrb[0].mxu0 %vm119_vm1, %v77_v44  ;;  %v294_v24 = vld [vmem:[#allocation5 + $0xd8] sm:$0xff]  ;;  %v1541_v26 = vpack.c.bf16 %v284_v18, %v281_v17  ;;  %v301_v27 = vld [vmem:[#allocation5 + $0x110] sm:$0xff]  ;;  %v1543_v28 = vpack.c.bf16 %v338_v21, %v335_v19  ;;  %v287_v29 = vld [vmem:[#allocation5 + $0xa0] sm:$0xff] }
  0x4a   :  { %1438 = vmatpush1.bf16.msra.mxu0 %v1437_v45  ;;  %1434 = vmatpush3.bf16.msra.mxu1 %v1433_v46  ;;  %v298_v25 = vld [vmem:[#allocation5 + $0xf8] sm:$0xff]  ;;  %v341_v31 = vld [vmem:[#allocation5 + $0x250] sm:$0xff]  ;;  %v344_v32 = vld [vmem:[#allocation5 + $0x268] sm:$0xff]  ;;  %v1453_v33 = vpack.c.bf16 %v294_v24, %v291_v23 }
  0x4b   :  { %1440 = vmatprep.subr.bf16.mxu0 %v1439_v47  ;;  %1532 = vmatprep.subr.bf16.mxu1 %v1531_v59  ;;  %v290_v30 = vld [vmem:[#allocation5 + $0xb8] sm:$0xff]  ;;  %v1455_v34 = vpack.c.bf16 %v301_v27, %v298_v25  ;;  %v297_v35 = vld [vmem:[#allocation5 + $0xf0] sm:$0xff]  ;;  %v300_v36 = vld [vmem:[#allocation5 + $0x108] sm:$0xff]  ;;  %v1547_v40 = vpack.c.bf16 %v344_v32, %v341_v31 }
  0x4c   :  { %v304_v37 = vld [vmem:[#allocation5 + $0x128] sm:$0xff]  ;;  %v1545_v38 = vpack.c.bf16 %v290_v30, %v287_v29  ;;  %v307_v39 = vld [vmem:[#allocation5 + $0x140] sm:$0xff]  ;;  %v293_v41 = vld [vmem:[#allocation5 + $0xd0] sm:$0xff]  ;;  %v1457_v45 = vpack.c.bf16 %v300_v36, %v297_v35 }
  0x4d   :  { %1335 = vmatmul.mubr.msk.f32.vlgmr.msra.gmra.mrb[0].mxu1 %vm119_vm1, %v77_v44  ;;  %v296_v42 = vld [vmem:[#allocation5 + $0xe8] sm:$0xff]  ;;  %v347_v43 = vld [vmem:[#allocation5 + $0x280] sm:$0xff]  ;;  %v350_v44 = vld [vmem:[#allocation5 + $0x298] sm:$0xff]  ;;  %v1459_v46 = vpack.c.bf16 %v307_v39, %v304_v37 }
  0x4e   :  { %1442 = vmatpush1.bf16.msra.mxu0 %v1441_v53  ;;  %1534 = vmatpush3.bf16.msra.mxu1 %v1533_v63  ;;  %v303_v47 = vld [vmem:[#allocation5 + $0x120] sm:$0xff]  ;;  %v306_v48 = vld [vmem:[#allocation5 + $0x138] sm:$0xff]  ;;  %v1549_v50 = vpack.c.bf16 %v296_v42, %v293_v41  ;;  %v313_v51 = vld [vmem:[#allocation5 + $0x170] sm:$0xff]  ;;  %v1551_v52 = vpack.c.bf16 %v350_v44, %v347_v43 }
  0x4f   :  { %1444 = vmatprep.subr.bf16.mxu0 %v1443_v57  ;;  %1536 = vmatprep.subr.bf16.mxu1 %v1535_v4  ;;  %v310_v49 = vld [vmem:[#allocation5 + $0x158] sm:$0xff]  ;;  %v299_v53 = vld [vmem:[#allocation5 + $0x100] sm:$0xff]  ;;  %v353_v55 = vld [vmem:[#allocation5 + $0x2b0] sm:$0xff]  ;;  %v1461_v57 = vpack.c.bf16 %v306_v48, %v303_v47 }
  0x50   :  { %v302_v54 = vld [vmem:[#allocation5 + $0x118] sm:$0xff]  ;;  %v356_v56 = vld [vmem:[#allocation5 + $0x2c8] sm:$0xff]  ;;  %v1463_v58 = vpack.c.bf16 %v313_v51, %v310_v49  ;;  %v309_v59 = vld [vmem:[#allocation5 + $0x150] sm:$0xff] }
  0x51   :  { %v312_v60 = vld [vmem:[#allocation5 + $0x168] sm:$0xff]  ;;  %v1553_v62 = vpack.c.bf16 %v302_v54, %v299_v53  ;;  %v319_v63 = vld [vmem:[#allocation5 + $0x1a0] sm:$0xff]  ;;  %v1555_v2 = vpack.c.bf16 %v356_v56, %v353_v55  ;;  %v305_v3 = vld [vmem:[#allocation5 + $0x130] sm:$0xff] }
  0x52   :  { %1446 = vmatpush1.bf16.msra.mxu0 %v1445_v6  ;;  %1538 = vmatpush3.bf16.msra.mxu1 %v1537_v12  ;;  %v316_v61 = vld [vmem:[#allocation5 + $0x188] sm:$0xff]  ;;  %v1465_v5 = vpack.c.bf16 %v312_v60, %v309_v59  ;;  %v315_v7 = vld [vmem:[#allocation5 + $0x180] sm:$0xff]  ;;  %v318_v8 = vld [vmem:[#allocation5 + $0x198] sm:$0xff] }
  0x53   :  { %1448 = vmatprep.subr.bf16.mxu0 %v1447_v10  ;;  %1540 = vmatprep.subr.bf16.mxu1 %v1539_v16  ;;  %v308_v4 = vld [vmem:[#allocation5 + $0x148] sm:$0xff]  ;;  %v1467_v6 = vpack.c.bf16 %v319_v63, %v316_v61  ;;  %v322_v10 = vld [vmem:[#allocation5 + $0x1b8] sm:$0xff]  ;;  %v325_v11 = vld [vmem:[#allocation5 + $0x1d0] sm:$0xff]  ;;  %v1469_v12 = vpack.c.bf16 %v318_v8, %v315_v7 }
  0x54   :  { %v1557_v9 = vpack.c.bf16 %v308_v4, %v305_v3  ;;  %v1471_v13 = vpack.c.bf16 %v325_v11, %v322_v10  ;;  %v321_v14 = vld [vmem:[#allocation5 + $0x1b0] sm:$0xff]  ;;  %v324_v15 = vld [vmem:[#allocation5 + $0x1c8] sm:$0xff]  ;;  %v331_v17 = vld [vmem:[#allocation5 + $0x200] sm:$0xff] }
  0x55   :  { %v328_v16 = vld [vmem:[#allocation5 + $0x1e8] sm:$0xff]  ;;  %v1473_v18 = vpack.c.bf16 %v324_v15, %v321_v14  ;;  %v330_v21 = vld [vmem:[#allocation5 + $0x1f8] sm:$0xff]  ;;  %v337_v23 = vld [vmem:[#allocation5 + $0x230] sm:$0xff] }
  0x56   :  { %1450 = vmatpush1.bf16.msra.mxu0 %v1449_v20  ;;  %1542 = vmatpush3.bf16.msra.mxu1 %v1541_v26  ;;  %v1475_v19 = vpack.c.bf16 %v331_v17, %v328_v16  ;;  %v327_v20 = vld [vmem:[#allocation5 + $0x1e0] sm:$0xff]  ;;  %v333_v26 = vld [vmem:[#allocation5 + $0x210] sm:$0xff]  ;;  %v336_v27 = vld [vmem:[#allocation5 + $0x228] sm:$0xff] }
  0x57   :  { %1452 = vmatprep.subr.bf16.mxu0 %v1451_v22  ;;  %1544 = vmatprep.subr.bf16.mxu1 %v1543_v28  ;;  %v334_v22 = vld [vmem:[#allocation5 + $0x218] sm:$0xff]  ;;  %v1477_v24 = vpack.c.bf16 %v330_v21, %v327_v20  ;;  %v340_v28 = vld [vmem:[#allocation5 + $0x248] sm:$0xff]  ;;  %v343_v29 = vld [vmem:[#allocation5 + $0x260] sm:$0xff]  ;;  %v1481_v30 = vpack.c.bf16 %v336_v27, %v333_v26 }
  0x58   :  { %v1479_v25 = vpack.c.bf16 %v337_v23, %v334_v22  ;;  %v1483_v31 = vpack.c.bf16 %v343_v29, %v340_v28  ;;  %v339_v32 = vld [vmem:[#allocation5 + $0x240] sm:$0xff]  ;;  %v349_v35 = vld [vmem:[#allocation5 + $0x290] sm:$0xff]  ;;  %v348_v39 = vld [vmem:[#allocation5 + $0x288] sm:$0xff] }
  0x59   :  { %v355_v41 = vld [vmem:[#allocation5 + $0x2c0] sm:$0xff]  ;;  %v358_v47 = vld [vmem:[#allocation5 + $0x2d8] sm:$0xff]  ;;  %v361_v48 = vld [vmem:[#allocation5 + $0x2f0] sm:$0xff] }
  0x5a   :  { %1454 = vmatpush1.bf16.msra.mxu0 %v1453_v33  ;;  %1546 = vmatpush3.bf16.msra.mxu1 %v1545_v38  ;;  %v342_v33 = vld [vmem:[#allocation5 + $0x258] sm:$0xff]  ;;  %v345_v38 = vld [vmem:[#allocation5 + $0x270] sm:$0xff]  ;;  %v351_v44 = vld [vmem:[#allocation5 + $0x2a0] sm:$0xff] }
  0x5b   :  { %1456 = vmatprep.subr.bf16.mxu0 %v1455_v34  ;;  %1548 = vmatprep.subr.bf16.mxu1 %v1547_v40  ;;  %v346_v34 = vld [vmem:[#allocation5 + $0x278] sm:$0xff]  ;;  %v1485_v36 = vpack.c.bf16 %v342_v33, %v339_v32  ;;  %v352_v40 = vld [vmem:[#allocation5 + $0x2a8] sm:$0xff]  ;;  %v1489_v42 = vpack.c.bf16 %v348_v39, %v345_v38  ;;  %v359_v49 = vld [vmem:[#allocation5 + $0x2e0] sm:$0xff] }
  0x5c   :  { %v1487_v37 = vpack.c.bf16 %v349_v35, %v346_v34  ;;  %v1491_v43 = vpack.c.bf16 %v355_v41, %v352_v40  ;;  %v362_v51 = vld [vmem:[#allocation5 + $0x2f8] sm:$0xff]  ;;  %v360_v53 = vld [vmem:[#allocation5 + $0x2e8] sm:$0xff]  ;;  %v311_v56 = vld [vmem:[#allocation5 + $0x160] sm:$0xff] }
  0x5d   :  { %v1559_v54 = vpack.c.bf16 %v362_v51, %v359_v49  ;;  %v364_v59 = vld [vmem:[#allocation5 + $0x308] sm:$0xff]  ;;  %v367_v60 = vld [vmem:[#allocation5 + $0x320] sm:$0xff]  ;;  %v366_v11 = vld [vmem:[#allocation5 + $0x318] sm:$0xff] }
  0x5e   :  { %1458 = vmatpush1.bf16.msra.mxu0 %v1457_v45  ;;  %1550 = vmatpush3.bf16.msra.mxu1 %v1549_v50  ;;  %v354_v45 = vld [vmem:[#allocation5 + $0x2b8] sm:$0xff]  ;;  %v1495_v50 = vpack.c.bf16 %v361_v48, %v358_v47  ;;  %v1499_v61 = vpack.c.bf16 %v367_v60, %v364_v59  ;;  %v1965_v3 = vld [vmem:[%s2037_s4] sm:$0x7]  ;;  %v373_v16 = vld [vmem:[#allocation5 + $0x350] sm:$0xff] }
  0x5f   :  { %1460 = vmatprep.subr.bf16.mxu0 %v1459_v46  ;;  %1552 = vmatprep.subr.bf16.mxu1 %v1551_v52  ;;  %v1493_v46 = vpack.c.bf16 %v354_v45, %v351_v44  ;;  %v357_v52 = vld [vmem:[#allocation5 + $0x2d0] sm:$0xff]  ;;  %v363_v8 = vld [vmem:[#allocation5 + $0x300] sm:$0xff]  ;;  %v370_v15 = vld [vmem:[#allocation5 + $0x338] sm:$0xff] }
  0x60   :  { %v1497_v55 = vpack.c.bf16 %v360_v53, %v357_v52  ;;  %v369_v20 = vld [vmem:[#allocation5 + $0x330] sm:$0xff]  ;;  %v1503_v22 = vpack.c.bf16 %v373_v16, %v370_v15  ;;  %v372_v23 = vld [vmem:[#allocation5 + $0x348] sm:$0xff]  ;;  %v379_v28 = vld [vmem:[#allocation5 + $0x380] sm:$0xff] }
  0x61   :  { %v376_v27 = vld [vmem:[#allocation5 + $0x368] sm:$0xff]  ;;  %v375_v32 = vld [vmem:[#allocation5 + $0x360] sm:$0xff]  ;;  %v378_v34 = vld [vmem:[#allocation5 + $0x378] sm:$0xff] }
  0x62   :  { %1462 = vmatpush1.bf16.msra.mxu0 %v1461_v57  ;;  %1554 = vmatpush3.bf16.msra.mxu1 %v1553_v62  ;;  %v314_v57 = vld [vmem:[#allocation5 + $0x178] sm:$0xff]  ;;  %v104_v62 = vlaneseq  ;;  %v1507_v33 = vpack.c.bf16 %v379_v28, %v376_v27  ;;  %v377_v35 = vld [vmem:[#allocation5 + $0x370] sm:$0xff]  ;;  %v1509_v39 = vpack.c.bf16 %v378_v34, %v375_v32  ;;  %v383_v44 = vld [vmem:[#allocation5 + $0x3a0] sm:$0xff] }
  0x63   :  { %1464 = vmatprep.subr.bf16.mxu0 %v1463_v58  ;;  %1556 = vmatprep.subr.bf16.mxu1 %v1555_v2  ;;  %v1561_v58 = vpack.c.bf16 %v314_v57, %v311_v56  ;;  %v385_v38 = vld [vmem:[#allocation5 + $0x3b0] sm:$0xff]  ;;  %v386_v45 = vld [vmem:[#allocation5 + $0x3b8] sm:$0xff]  ;;  %v391_v47 = vld [vmem:[#allocation5 + $0x3e0] sm:$0xff] }
  0x64   :  { %v1957_v63 = vshrl.u32 %v104_v62, 7  ;;  %v381_v41 = vld [vmem:[#allocation5 + $0x390] sm:$0xff]  ;;  %v1573_v49 = vpack.c.bf16 %v386_v45, %v383_v44  ;;  %v390_v52 = vld [vmem:[#allocation5 + $0x3d8] sm:$0xff]  ;;  %v395_v62 = vld [vmem:[#allocation5 + $0x400] sm:$0xff] }
  0x65   :  { %v389_v53 = vld [vmem:[#allocation5 + $0x3d0] sm:$0xff]  ;;  %v404_v15 = vld [vmem:[#allocation5 + $0x448] sm:$0xff]  ;;  %v406_v16 = vld [vmem:[#allocation5 + $0x458] sm:$0xff] }
  0x66   :  { %1466 = vmatpush1.bf16.msra.mxu0 %v1465_v5  ;;  %1558 = vmatpush3.bf16.msra.mxu1 %v1557_v9  ;;  %v1960_v2 = vsub.s32 0, %v1957_v63  ;;  %v1968_v4 = vsub.s32 1, %v1957_v63  ;;  %v397_v56 = vld [vmem:[#allocation5 + $0x410] sm:$0xff]  ;;  %v717_v27 = vld [vmem:[#allocation7 + $0x20] sm:$0xff]  ;;  %v716_v32 = vld [vmem:[#allocation7 + $0x18] sm:$0xff] }
  0x67   :  { %1468 = vmatprep.subr.bf16.mxu0 %v1467_v6  ;;  %1560 = vmatprep.subr.bf16.mxu1 %v1559_v54  ;;  %v392_v54 = vld [vmem:[#allocation5 + $0x3e8] sm:$0xff]  ;;  %v393_v59 = vld [vmem:[#allocation5 + $0x3f0] sm:$0xff]  ;;  %v728_v44 = vld [vmem:[#allocation7 + $0x78] sm:$0xff] }
  0x68   :  { %v107_v5 = vrot.slane %v1965_v3, %v1960_v2  ;;  %v111_v6 = vrot.slane %v1965_v3, %v1968_v4  ;;  %v723_v34 = vld [vmem:[#allocation7 + $0x50] sm:$0xff]  ;;  %v732_v45 = vld [vmem:[#allocation7 + $0x98] sm:$0xff] }
  0x6a   :  { %1470 = vmatpush1.bf16.msra.mxu0 %v1469_v12  ;;  %1562 = vmatpush3.bf16.msra.mxu1 %v1561_v58  ;;  %v365_v12 = vld [vmem:[#allocation5 + $0x310] sm:$0xff]  ;;  %v1576_v58 = vpack.c.bf16 %v392_v54, %v389_v53 }
  0x6b   :  { %1472 = vmatprep.subr.bf16.mxu0 %v1471_v13  ;;  %1563 = vmatprep.subr.bf16.mxu1 %v1835_v1  ;;  %v368_v13 = vld [vmem:[#allocation5 + $0x328] sm:$0xff] }
  0x6e   :  { %1474 = vmatpush1.bf16.msra.mxu0 %v1473_v18  ;;  %v1501_v18 = vpack.c.bf16 %v366_v11, %v363_v8  ;;  %v1984_v8 = vsub.s32 2, %v1957_v63  ;;  %v399_v11 = vld [vmem:[#allocation5 + $0x420] sm:$0xff] }
  0x6f   :  { %1476 = vmatprep.subr.bf16.mxu0 %v1475_v19  ;;  %v1564_v19 = vpack.c.bf16 %v368_v13, %v365_v12  ;;  %v402_v13 = vld [vmem:[#allocation5 + $0x438] sm:$0xff] }
  0x70   :  { %v1525_v63 = vpack.c.bf16 %v402_v13, %v399_v11  ;;  %v752_v11 = vld [vmem:[#allocation7 + $0x138] sm:$0xff] }
  0x71   :  { %v756_v13 = vld [vmem:[#allocation7 + $0x158] sm:$0xff] }
  0x72   :  { %1478 = vmatpush1.bf16.msra.mxu0 %v1477_v24  ;;  %v371_v24 = vld [vmem:[#allocation5 + $0x340] sm:$0xff] }
  0x73   :  { %1480 = vmatprep.subr.bf16.mxu0 %v1479_v25  ;;  %v374_v25 = vld [vmem:[#allocation5 + $0x358] sm:$0xff] }
  0x76   :  { %1482 = vmatpush1.bf16.msra.mxu0 %v1481_v30  ;;  %v1505_v30 = vpack.c.bf16 %v372_v23, %v369_v20  ;;  %v405_v20 = vld [vmem:[#allocation5 + $0x450] sm:$0xff]  ;;  %v407_v23 = vld [vmem:[#allocation5 + $0x460] sm:$0xff] }
  0x77   :  { %1484 = vmatprep.subr.bf16.mxu0 %v1483_v31  ;;  %v1567_v31 = vpack.c.bf16 %v374_v25, %v371_v24  ;;  %v410_v24 = vld [vmem:[#allocation5 + $0x478] sm:$0xff]  ;;  %v714_v25 = vld [vmem:[#allocation7 + $0x8] sm:$0xff] }
  0x7a   :  { %1486 = vmatpush1.bf16.msra.mxu0 %v1485_v36  ;;  %v380_v36 = vld [vmem:[#allocation5 + $0x388] sm:$0xff] }
  0x7b   :  { %1488 = vmatprep.subr.bf16.mxu0 %v1487_v37  ;;  %v382_v37 = vld [vmem:[#allocation5 + $0x398] sm:$0xff]  ;;  %v1570_v40 = vpack.c.bf16 %v380_v36, %v377_v35 }
  0x7e   :  { %1490 = vmatpush1.bf16.msra.mxu0 %v1489_v42  ;;  %v1511_v42 = vpack.c.bf16 %v385_v38, %v382_v37  ;;  %v719_v38 = vld [vmem:[#allocation7 + $0x30] sm:$0xff] }
  0x7f   :  { %1492 = vmatprep.subr.bf16.mxu0 %v1491_v43  ;;  %v384_v43 = vld [vmem:[#allocation5 + $0x3a8] sm:$0xff] }
  0x80   :  { %v1513_v48 = vpack.c.bf16 %v384_v43, %v381_v41  ;;  %v725_v43 = vld [vmem:[#allocation7 + $0x60] sm:$0xff] }
  0x82   :  { %1494 = vmatpush1.bf16.msra.mxu0 %v1493_v46  ;;  %v388_v46 = vld [vmem:[#allocation5 + $0x3c8] sm:$0xff] }
  0x83   :  { %1496 = vmatprep.subr.bf16.mxu0 %v1495_v50  ;;  %v387_v50 = vld [vmem:[#allocation5 + $0x3c0] sm:$0xff]  ;;  %v1515_v51 = vpack.c.bf16 %v391_v47, %v388_v46  ;;  %v735_v46 = vld [vmem:[#allocation7 + $0xb0] sm:$0xff]  ;;  %v1597_v47 = vpack.c.bf16 %v728_v44, %v725_v43 }
  0x84   :  { %v1517_v57 = vpack.c.bf16 %v390_v52, %v387_v50  ;;  %v734_v50 = vld [vmem:[#allocation7 + $0xa8] sm:$0xff]  ;;  %v741_v52 = vld [vmem:[#allocation7 + $0xe0] sm:$0xff]  ;;  %v775_v44 = vld [vmem:[#allocation7 + $0x1f0] sm:$0xff] }
  0x86   :  { %1498 = vmatpush1.bf16.msra.mxu0 %v1497_v55  ;;  %v394_v55 = vld [vmem:[#allocation5 + $0x3f8] sm:$0xff] }
  0x87   :  { %1500 = vmatprep.subr.bf16.mxu0 %v1499_v61  ;;  %v1519_v60 = vpack.c.bf16 %v397_v56, %v394_v55  ;;  %v396_v61 = vld [vmem:[#allocation5 + $0x408] sm:$0xff]  ;;  %v737_v55 = vld [vmem:[#allocation7 + $0xc0] sm:$0xff]  ;;  %v740_v56 = vld [vmem:[#allocation7 + $0xd8] sm:$0xff] }
 0x11c   :  { %v189_v7 = vpop.f32.mrb[0].mxu0 }
 0x11d   :  { %v190_v9 = vadd.f32 %v189_v7, %v107_v5  ;;  %v191_v10 = vpop.f32.mrb[1].mxu0  ;;  %v398_v5 = vld [vmem:[#allocation5 + $0x418] sm:$0xff]  ;;  %v403_v7 = vld [vmem:[#allocation5 + $0x440] sm:$0xff] }
 0x11e   :  { %v192_v14 = vadd.f32 %v191_v10, %v111_v6  ;;  %v400_v6 = vld [vmem:[#allocation5 + $0x428] sm:$0xff]  ;;  %v1579_v10 = vpack.c.bf16 %v398_v5, %v395_v62 }
 0x11f   :  { %v264_v21 = vmax.f32 %v190_v9, 0.0  ;;  %v1521_v9 = vpack.c.bf16 %v396_v61, %v393_v59  ;;  %v1523_v12 = vpack.c.bf16 %v403_v7, %v400_v6  ;;  %v1605_v59 = vpack.c.bf16 %v740_v56, %v737_v55  ;;  %v743_v61 = vld [vmem:[#allocation7 + $0xf0] sm:$0xff]  ;;  %v746_v62 = vld [vmem:[#allocation7 + $0x108] sm:$0xff]  ;;  %v753_v6 = vld [vmem:[#allocation7 + $0x140] sm:$0xff] }
 0x120   :  { %v265_v17 = vmax.f32 %v192_v14, 0.0  ;;  %v1974_v26 = vpop.f32.mrb[0].mxu1  ;;  %v401_v14 = vld [vmem:[#allocation5 + $0x430] sm:$0xff]  ;;  %v750_v5 = vld [vmem:[#allocation7 + $0x128] sm:$0xff]  ;;  %v1609_v7 = vpack.c.bf16 %v746_v62, %v743_v61  ;;  %v784_v56 = vld [vmem:[#allocation7 + $0x238] sm:$0xff] }
 0x121   :  { %v1336_v29 = vpop.f32.mrb[1].mxu1  ;;  %v733_v61 = vld [vmem:[#allocation7 + $0xa0] sm:$0xff]  ;;  %v736_v62 = vld [vmem:[#allocation7 + $0xb8] sm:$0xff] }
 0x122   :  { %492 = vmatprep.mubr.f32.mxu0 %v265_v17  ;;  %634 = vmatprep.mubr.f32.mxu1 %v265_v17  ;;  %v409_v17 = vld [vmem:[#allocation5 + $0x470] sm:$0xff] }
 0x123   :  { %493 = vmatmul.mubr.f32.vlgmr.msra.gmra.mrb[2].mxu0 %v264_v21  ;;  %635 = vmatmul.mubr.f32.vlgmr.msra.gmra.mrb[2].mxu1 %v264_v21  ;;  %v1527_v21 = vpack.c.bf16 %v409_v17, %v406_v16  ;;  %v755_v16 = vld [vmem:[#allocation7 + $0x150] sm:$0xff]  ;;  %v758_v17 = vld [vmem:[#allocation7 + $0x168] sm:$0xff] }
 0x124   :  { %1502 = vmatpush1.bf16.msra.mxu0 %v1501_v18  ;;  %1565 = vmatpush3.bf16.msra.mxu1 %v1564_v19  ;;  %v115_v18 = vrot.slane %v1965_v3, %v1984_v8  ;;  %v1582_v19 = vpack.c.bf16 %v404_v15, %v401_v14  ;;  %v1585_v3 = vpack.c.bf16 %v410_v24, %v407_v23  ;;  %v759_v14 = vld [vmem:[#allocation7 + $0x170] sm:$0xff]  ;;  %v761_v23 = vld [vmem:[#allocation7 + $0x180] sm:$0xff]  ;;  %v764_v24 = vld [vmem:[#allocation7 + $0x198] sm:$0xff] }
 0x125   :  { %1504 = vmatprep.subr.bf16.mxu0 %v1503_v22  ;;  %1566 = vmatprep.subr.bf16.mxu1 %v1835_v1  ;;  %v408_v22 = vld [vmem:[#allocation5 + $0x468] sm:$0xff]  ;;  %v1615_v15 = vpack.c.bf16 %v759_v14, %v756_v13  ;;  %v788_v13 = vld [vmem:[#allocation7 + $0x258] sm:$0xff] }
 0x126   :  { %563 = vmatprep.mubr.f32.mxu0 %v1834_v0  ;;  %1369 = vmatprep.mubr.msk.f32.mxu1 %vm1836_vm0, %v1834_v0  ;;  %v261_v28 = vadd.f32 %v1974_v26, %v115_v18  ;;  %v1529_v29 = vpack.c.bf16 %v408_v22, %v405_v20  ;;  %v722_v26 = vld [vmem:[#allocation7 + $0x48] sm:$0xff]  ;;  %v1617_v18 = vpack.c.bf16 %v758_v17, %v755_v16  ;;  %v763_v20 = vld [vmem:[#allocation7 + $0x190] sm:$0xff] }
 0x127   :  { %v1593_v41 = vpack.c.bf16 %v722_v26, %v719_v38  ;;  %v766_v22 = vld [vmem:[#allocation7 + $0x1a8] sm:$0xff]  ;;  %v721_v38 = vld [vmem:[#allocation7 + $0x40] sm:$0xff]  ;;  %v739_v16 = vld [vmem:[#allocation7 + $0xd0] sm:$0xff] }
 0x128   :  { %1506 = vmatpush1.bf16.msra.mxu0 %v1505_v30  ;;  %1568 = vmatpush3.bf16.msra.mxu1 %v1567_v31  ;;  %v1587_v30 = vpack.c.bf16 %v717_v27, %v714_v25  ;;  %v713_v31 = vld [vmem:[#allocation7] sm:$0xff]  ;;  %v266_v35 = vmax.f32 %v261_v28, 0.0  ;;  %v1683_v25 = vpack.c.bf16 %v766_v22, %v763_v20  ;;  %v1621_v27 = vpack.c.bf16 %v764_v24, %v761_v23  ;;  %v715_v28 = vld [vmem:[#allocation7 + $0x10] sm:$0xff]  ;;  %v742_v17 = vld [vmem:[#allocation7 + $0xe8] sm:$0xff] }
 0x129   :  { %1508 = vmatprep.subr.bf16.mxu0 %v1507_v33  ;;  %1569 = vmatprep.subr.bf16.mxu1 %v1835_v1  ;;  %v720_v33 = vld [vmem:[#allocation7 + $0x38] sm:$0xff]  ;;  %v1589_v36 = vpack.c.bf16 %v716_v32, %v713_v31  ;;  %v771_v31 = vld [vmem:[#allocation7 + $0x1d0] sm:$0xff]  ;;  %v769_v32 = vld [vmem:[#allocation7 + $0x1c0] sm:$0xff]  ;;  %v1701_v22 = vpack.c.bf16 %v742_v17, %v739_v16 }
 0x12a   :  { %v1591_v37 = vpack.c.bf16 %v723_v34, %v720_v33  ;;  %v772_v33 = vld [vmem:[#allocation7 + $0x1d8] sm:$0xff]  ;;  %v791_v23 = vld [vmem:[#allocation7 + $0x270] sm:$0xff]  ;;  %v794_v24 = vld [vmem:[#allocation7 + $0x288] sm:$0xff] }
 0x12b   :  { %v796_v20 = vld [vmem:[#allocation7 + $0x298] sm:$0xff]  ;;  %v811_v16 = vld [vmem:[#allocation7 + $0x310] sm:$0xff]  ;;  %v814_v17 = vld [vmem:[#allocation7 + $0x328] sm:$0xff] }
 0x12c   :  { %1510 = vmatpush1.bf16.msra.mxu0 %v1509_v39  ;;  %1571 = vmatpush3.bf16.msra.mxu1 %v1570_v40  ;;  %v726_v39 = vld [vmem:[#allocation7 + $0x68] sm:$0xff]  ;;  %v729_v40 = vld [vmem:[#allocation7 + $0x80] sm:$0xff] }
 0x12d   :  { %1512 = vmatprep.subr.bf16.mxu0 %v1511_v42  ;;  %1572 = vmatprep.subr.bf16.mxu1 %v1835_v1  ;;  %v1595_v42 = vpack.c.bf16 %v729_v40, %v726_v39  ;;  %v724_v39 = vld [vmem:[#allocation7 + $0x58] sm:$0xff]  ;;  %v774_v40 = vld [vmem:[#allocation7 + $0x1e8] sm:$0xff] }
 0x130   :  { %1514 = vmatpush1.bf16.msra.mxu0 %v1513_v48  ;;  %1574 = vmatpush3.bf16.msra.mxu1 %v1573_v49  ;;  %v1599_v48 = vpack.c.bf16 %v735_v46, %v732_v45  ;;  %v731_v49 = vld [vmem:[#allocation7 + $0x90] sm:$0xff]  ;;  %v778_v45 = vld [vmem:[#allocation7 + $0x208] sm:$0xff]  ;;  %v773_v46 = vld [vmem:[#allocation7 + $0x1e0] sm:$0xff] }
 0x131   :  { %1516 = vmatprep.subr.bf16.mxu0 %v1515_v51  ;;  %1575 = vmatprep.subr.bf16.mxu1 %v1835_v1  ;;  %v738_v51 = vld [vmem:[#allocation7 + $0xc8] sm:$0xff]  ;;  %v1601_v53 = vpack.c.bf16 %v734_v50, %v731_v49  ;;  %v727_v49 = vld [vmem:[#allocation7 + $0x70] sm:$0xff] }
 0x132   :  { %v1603_v54 = vpack.c.bf16 %v741_v52, %v738_v51  ;;  %v730_v50 = vld [vmem:[#allocation7 + $0x88] sm:$0xff]  ;;  %v780_v51 = vld [vmem:[#allocation7 + $0x218] sm:$0xff]  ;;  %v783_v52 = vld [vmem:[#allocation7 + $0x230] sm:$0xff] }
 0x133   :  { %v1693_v55 = vpack.c.bf16 %v730_v50, %v727_v49 }
 0x134   :  { %1518 = vmatpush1.bf16.msra.mxu0 %v1517_v57  ;;  %1577 = vmatpush3.bf16.msra.mxu1 %v1576_v58  ;;  %v744_v57 = vld [vmem:[#allocation7 + $0xf8] sm:$0xff]  ;;  %v747_v58 = vld [vmem:[#allocation7 + $0x110] sm:$0xff] }
 0x135   :  { %1520 = vmatprep.subr.bf16.mxu0 %v1519_v60  ;;  %1578 = vmatprep.subr.bf16.mxu1 %v1835_v1  ;;  %v1607_v60 = vpack.c.bf16 %v747_v58, %v744_v57  ;;  %v779_v57 = vld [vmem:[#allocation7 + $0x210] sm:$0xff]  ;;  %v782_v58 = vld [vmem:[#allocation7 + $0x228] sm:$0xff] }
 0x138   :  { %1522 = vmatpush1.bf16.msra.mxu0 %v1521_v9  ;;  %1580 = vmatpush3.bf16.msra.mxu1 %v1579_v10  ;;  %v1611_v9 = vpack.c.bf16 %v753_v6, %v750_v5  ;;  %v749_v10 = vld [vmem:[#allocation7 + $0x120] sm:$0xff]  ;;  %v786_v5 = vld [vmem:[#allocation7 + $0x248] sm:$0xff] }
 0x139   :  { %1524 = vmatprep.subr.bf16.mxu0 %v1523_v12  ;;  %1581 = vmatprep.subr.bf16.mxu1 %v1835_v1  ;;  %v1613_v12 = vpack.c.bf16 %v752_v11, %v749_v10  ;;  %v789_v6 = vld [vmem:[#allocation7 + $0x260] sm:$0xff]  ;;  %v1633_v10 = vpack.c.bf16 %v782_v58, %v779_v57  ;;  %v1697_v11 = vpack.c.bf16 %v736_v62, %v733_v61 }
 0x13a   :  { %v1635_v14 = vpack.c.bf16 %v789_v6, %v786_v5 }
 0x13c   :  { %1526 = vmatpush1.bf16.msra.mxu0 %v1525_v63  ;;  %1583 = vmatpush3.bf16.msra.mxu1 %v1582_v19  ;;  %v762_v63 = vld [vmem:[#allocation7 + $0x188] sm:$0xff]  ;;  %v765_v19 = vld [vmem:[#allocation7 + $0x1a0] sm:$0xff] }
 0x13d   :  { %1528 = vmatprep.subr.bf16.mxu0 %v1527_v21  ;;  %1584 = vmatprep.subr.bf16.mxu1 %v1835_v1  ;;  %v1619_v21 = vpack.c.bf16 %v765_v19, %v762_v63  ;;  %v795_v63 = vld [vmem:[#allocation7 + $0x290] sm:$0xff]  ;;  %v793_v19 = vld [vmem:[#allocation7 + $0x280] sm:$0xff] }
 0x140   :  { %1530 = vmatpush1.bf16.msra.mxu0 %v1529_v29  ;;  %1586 = vmatpush3.bf16.msra.mxu1 %v1585_v3  ;;  %v718_v29 = vld [vmem:[#allocation7 + $0x28] sm:$0xff]  ;;  %v768_v3 = vld [vmem:[#allocation7 + $0x1b8] sm:$0xff] }
 0x141   :  { %1588 = vmatprep.subr.bf16.mxu1 %v1587_v30  ;;  %v1685_v30 = vpack.c.bf16 %v718_v29, %v715_v28  ;;  %1684 = vmatprep.subr.bf16.mxu0 %v1683_v25  ;;  %v1623_v34 = vpack.c.bf16 %v771_v31, %v768_v3  ;;  %v745_v28 = vld [vmem:[#allocation7 + $0x100] sm:$0xff]  ;;  %v748_v29 = vld [vmem:[#allocation7 + $0x118] sm:$0xff]  ;;  %v798_v3 = vld [vmem:[#allocation7 + $0x2a8] sm:$0xff] }
 0x142   :  { %v799_v31 = vld [vmem:[#allocation7 + $0x2b0] sm:$0xff] }
 0x143   :  { %564 = vmatmul.mubr.f32.vlgmr.msra.gmra.mrb[2].mxu0 %v266_v35  ;;  %1370 = vmatmul.mubr.f32.vlgmr.msra.gmra.mrb[4].mxu1 %v266_v35  ;;  %v1687_v35 = vpack.c.bf16 %v772_v33, %v769_v32  ;;  %v802_v32 = vld [vmem:[#allocation7 + $0x2c8] sm:$0xff]  ;;  %v1641_v33 = vpack.c.bf16 %v794_v24, %v791_v23  ;;  %v815_v23 = vld [vmem:[#allocation7 + $0x330] sm:$0xff] }
 0x144   :  { %1590 = vmatpush1.bf16.msra.mxu1 %v1589_v36  ;;  %v767_v36 = vld [vmem:[#allocation7 + $0x1b0] sm:$0xff]  ;;  %1686 = vmatpush3.bf16.msra.mxu0 %v1685_v30  ;;  %v801_v30 = vld [vmem:[#allocation7 + $0x2c0] sm:$0xff] }
 0x145   :  { %1592 = vmatprep.subr.bf16.mxu1 %v1591_v37  ;;  %v770_v37 = vld [vmem:[#allocation7 + $0x1c8] sm:$0xff]  ;;  %1688 = vmatprep.subr.bf16.mxu0 %v1687_v35  ;;  %v797_v35 = vld [vmem:[#allocation7 + $0x2a0] sm:$0xff] }
 0x146   :  { %v1625_v26 = vpack.c.bf16 %v770_v37, %v767_v36  ;;  %v1643_v36 = vpack.c.bf16 %v801_v30, %v798_v3  ;;  %v1707_v37 = vpack.c.bf16 %v802_v32, %v799_v31  ;;  %v822_v3 = vld [vmem:[#allocation7 + $0x368] sm:$0xff]  ;;  %v825_v30 = vld [vmem:[#allocation7 + $0x380] sm:$0xff] }
 0x148   :  { %1594 = vmatpush1.bf16.msra.mxu1 %v1593_v41  ;;  %v777_v41 = vld [vmem:[#allocation7 + $0x200] sm:$0xff] }
 0x149   :  { %1596 = vmatprep.subr.bf16.mxu1 %v1595_v42  ;;  %v1689_v42 = vpack.c.bf16 %v724_v39, %v721_v38  ;;  %v1627_v43 = vpack.c.bf16 %v777_v41, %v774_v40  ;;  %v800_v38 = vld [vmem:[#allocation7 + $0x2b8] sm:$0xff]  ;;  %v754_v39 = vld [vmem:[#allocation7 + $0x148] sm:$0xff] }
 0x14a   :  { %v1645_v40 = vpack.c.bf16 %v800_v38, %v797_v35  ;;  %v824_v35 = vld [vmem:[#allocation7 + $0x378] sm:$0xff] }
 0x14b   :  { %1690 = vmatpush3.bf16.msra.mxu0 %v1689_v42  ;;  %v804_v42 = vld [vmem:[#allocation7 + $0x2d8] sm:$0xff] }
 0x14c   :  { %1598 = vmatpush1.bf16.msra.mxu1 %v1597_v47  ;;  %v1691_v47 = vpack.c.bf16 %v778_v45, %v775_v44  ;;  %v805_v44 = vld [vmem:[#allocation7 + $0x2e0] sm:$0xff]  ;;  %v828_v38 = vld [vmem:[#allocation7 + $0x398] sm:$0xff] }
 0x14d   :  { %1600 = vmatprep.subr.bf16.mxu1 %v1599_v48  ;;  %v776_v48 = vld [vmem:[#allocation7 + $0x1f8] sm:$0xff] }
 0x14e   :  { %1692 = vmatprep.subr.bf16.mxu0 %v1691_v47  ;;  %v803_v47 = vld [vmem:[#allocation7 + $0x2d0] sm:$0xff] }
 0x14f   :  { %1694 = vmatpush3.bf16.msra.mxu0 %v1693_v55  ;;  %v813_v55 = vld [vmem:[#allocation7 + $0x320] sm:$0xff] }
 0x150   :  { %1602 = vmatpush1.bf16.msra.mxu1 %v1601_v53  ;;  %v781_v53 = vld [vmem:[#allocation7 + $0x220] sm:$0xff] }
 0x151   :  { %1604 = vmatprep.subr.bf16.mxu1 %v1603_v54  ;;  %v1629_v54 = vpack.c.bf16 %v776_v48, %v773_v46  ;;  %v808_v46 = vld [vmem:[#allocation7 + $0x2f8] sm:$0xff]  ;;  %v806_v48 = vld [vmem:[#allocation7 + $0x2e8] sm:$0xff] }
 0x152   :  { %v1711_v49 = vpack.c.bf16 %v808_v46, %v805_v44  ;;  %v1649_v50 = vpack.c.bf16 %v806_v48, %v803_v47  ;;  %v829_v44 = vld [vmem:[#allocation7 + $0x3a0] sm:$0xff]  ;;  %v834_v46 = vld [vmem:[#allocation7 + $0x3c8] sm:$0xff] }
 0x153   :  { %v837_v47 = vld [vmem:[#allocation7 + $0x3e0] sm:$0xff] }
 0x154   :  { %1606 = vmatpush1.bf16.msra.mxu1 %v1605_v59  ;;  %v1631_v59 = vpack.c.bf16 %v783_v52, %v780_v51  ;;  %v757_v51 = vld [vmem:[#allocation7 + $0x160] sm:$0xff]  ;;  %v760_v52 = vld [vmem:[#allocation7 + $0x178] sm:$0xff] }
 0x155   :  { %1608 = vmatprep.subr.bf16.mxu1 %v1607_v60  ;;  %v1695_v60 = vpack.c.bf16 %v784_v56, %v781_v53  ;;  %v1713_v53 = vpack.c.bf16 %v760_v52, %v757_v51  ;;  %v836_v51 = vld [vmem:[#allocation7 + $0x3d8] sm:$0xff]  ;;  %v835_v52 = vld [vmem:[#allocation7 + $0x3d0] sm:$0xff] }
 0x157   :  { %1696 = vmatprep.subr.bf16.mxu0 %v1695_v60  ;;  %v411_v60 = vld [vmem:[%s2039_s6] sm:$0x7] }
 0x158   :  { %1610 = vmatpush1.bf16.msra.mxu1 %v1609_v7  ;;  %v787_v7 = vld [vmem:[#allocation7 + $0x250] sm:$0xff]  ;;  %1698 = vmatpush3.bf16.msra.mxu0 %v1697_v11  ;;  %v424_v61 = vrot.slane %v411_v60, %v1984_v8  ;;  %v416_v62 = vrot.slane %v411_v60, %v1960_v2  ;;  %v420_v5 = vrot.slane %v411_v60, %v1968_v4  ;;  %v842_v60 = vld [vmem:[#allocation7 + $0x408] sm:$0xff] }
 0x159   :  { %1612 = vmatprep.subr.bf16.mxu1 %v1611_v9  ;;  %v790_v9 = vld [vmem:[#allocation7 + $0x268] sm:$0xff] }
 0x15c   :  { %1614 = vmatpush1.bf16.msra.mxu1 %v1613_v12  ;;  %v785_v12 = vld [vmem:[#allocation7 + $0x240] sm:$0xff] }
 0x15d   :  { %1616 = vmatprep.subr.bf16.mxu1 %v1615_v15  ;;  %v1699_v15 = vpack.c.bf16 %v790_v9, %v787_v7 }
 0x15f   :  { %1700 = vmatprep.subr.bf16.mxu0 %v1699_v15  ;;  %v812_v15 = vld [vmem:[#allocation7 + $0x318] sm:$0xff] }
 0x160   :  { %1618 = vmatpush1.bf16.msra.mxu1 %v1617_v18  ;;  %v792_v18 = vld [vmem:[#allocation7 + $0x278] sm:$0xff]  ;;  %1702 = vmatpush3.bf16.msra.mxu0 %v1701_v22  ;;  %v1716_v22 = vpack.c.bf16 %v814_v17, %v811_v16  ;;  %v855_v17 = vld [vmem:[#allocation7 + $0x470] sm:$0xff] }
 0x161   :  { %1620 = vmatprep.subr.bf16.mxu1 %v1619_v21  ;;  %v1637_v21 = vpack.c.bf16 %v788_v13, %v785_v12  ;;  %v1639_v25 = vpack.c.bf16 %v795_v63, %v792_v18  ;;  %v816_v63 = vld [vmem:[#allocation7 + $0x338] sm:$0xff] }
 0x162   :  { %v852_v16 = vld [vmem:[#allocation7 + $0x458] sm:$0xff] }
 0x164   :  { %1622 = vmatpush1.bf16.msra.mxu1 %v1621_v27  ;;  %v1703_v27 = vpack.c.bf16 %v796_v20, %v793_v19  ;;  %v819_v19 = vld [vmem:[#allocation7 + $0x350] sm:$0xff] }
 0x165   :  { %1624 = vmatprep.subr.bf16.mxu1 %v1623_v34  ;;  %v1705_v34 = vpack.c.bf16 %v748_v29, %v745_v28  ;;  %v817_v28 = vld [vmem:[#allocation7 + $0x340] sm:$0xff]  ;;  %v820_v29 = vld [vmem:[#allocation7 + $0x358] sm:$0xff] }
 0x166   :  { %1704 = vmatprep.subr.bf16.mxu0 %v1703_v27  ;;  %v818_v27 = vld [vmem:[#allocation7 + $0x348] sm:$0xff]  ;;  %v1719_v32 = vpack.c.bf16 %v820_v29, %v817_v28 }
 0x167   :  { %1706 = vmatpush3.bf16.msra.mxu0 %v1705_v34  ;;  %v1657_v31 = vpack.c.bf16 %v818_v27, %v815_v23  ;;  %v1659_v34 = vpack.c.bf16 %v825_v30, %v822_v3  ;;  %v856_v23 = vld [vmem:[#allocation7 + $0x478] sm:$0xff]  ;;  %v857_v30 = vld [vmem:[%s2041_s8] sm:$0x7] }
 0x168   :  { %1626 = vmatpush1.bf16.msra.mxu1 %v1625_v26  ;;  %v751_v26 = vld [vmem:[#allocation7 + $0x130] sm:$0xff]  ;;  %1708 = vmatprep.subr.bf16.mxu0 %v1707_v37  ;;  %v826_v37 = vld [vmem:[#allocation7 + $0x388] sm:$0xff] }
 0x169   :  { %1628 = vmatprep.subr.bf16.mxu1 %v1627_v43  ;;  %v1709_v41 = vpack.c.bf16 %v754_v39, %v751_v26  ;;  %v807_v43 = vld [vmem:[#allocation7 + $0x2f0] sm:$0xff] }
 0x16a   :  { %v1647_v45 = vpack.c.bf16 %v807_v43, %v804_v42  ;;  %v831_v26 = vld [vmem:[#allocation7 + $0x3b0] sm:$0xff]  ;;  %v830_v43 = vld [vmem:[#allocation7 + $0x3a8] sm:$0xff] }
 0x16b   :  { %1710 = vmatpush3.bf16.msra.mxu0 %v1709_v41  ;;  %v827_v41 = vld [vmem:[#allocation7 + $0x390] sm:$0xff]  ;;  %v1663_v42 = vpack.c.bf16 %v831_v26, %v828_v38 }
 0x16c   :  { %1630 = vmatpush1.bf16.msra.mxu1 %v1629_v54  ;;  %1712 = vmatprep.subr.bf16.mxu0 %v1711_v49  ;;  %v810_v54 = vld [vmem:[#allocation7 + $0x308] sm:$0xff]  ;;  %v1665_v48 = vpack.c.bf16 %v830_v43, %v827_v41 }
 0x16d   :  { %1632 = vmatprep.subr.bf16.mxu1 %v1631_v59  ;;  %v1651_v56 = vpack.c.bf16 %v813_v55, %v810_v54  ;;  %v840_v54 = vld [vmem:[#allocation7 + $0x3f8] sm:$0xff]  ;;  %v843_v55 = vld [vmem:[#allocation7 + $0x410] sm:$0xff] }
 0x16f   :  { %1714 = vmatpush3.bf16.msra.mxu0 %v1713_v53  ;;  %v838_v53 = vld [vmem:[#allocation7 + $0x3e8] sm:$0xff] }
 0x170   :  { %1634 = vmatpush1.bf16.msra.mxu1 %v1633_v10  ;;  %1715 = vmatprep.subr.bf16.mxu0 %v1835_v1  ;;  %v809_v10 = vld [vmem:[#allocation7 + $0x300] sm:$0xff] }
 0x171   :  { %1636 = vmatprep.subr.bf16.mxu1 %v1635_v14 }
 0x174   :  { %1638 = vmatpush1.bf16.msra.mxu1 %v1637_v21  ;;  %v1653_v21 = vpack.c.bf16 %v812_v15, %v809_v10  ;;  %v845_v10 = vld [vmem:[#allocation7 + $0x420] sm:$0xff]  ;;  %v850_v15 = vld [vmem:[#allocation7 + $0x448] sm:$0xff] }
 0x175   :  { %1640 = vmatprep.subr.bf16.mxu1 %v1639_v25  ;;  %v1655_v25 = vpack.c.bf16 %v819_v19, %v816_v63  ;;  %v851_v19 = vld [vmem:[#allocation7 + $0x450] sm:$0xff] }
 0x178   :  { %1642 = vmatpush1.bf16.msra.mxu1 %v1641_v33  ;;  %v821_v33 = vld [vmem:[#allocation7 + $0x360] sm:$0xff] }
 0x179   :  { %1644 = vmatprep.subr.bf16.mxu1 %v1643_v36  ;;  %v823_v36 = vld [vmem:[#allocation7 + $0x370] sm:$0xff]  ;;  %v1661_v39 = vpack.c.bf16 %v824_v35, %v821_v33  ;;  %v866_v33 = vrot.slane %v857_v30, %v1968_v4 }
 0x17c   :  { %1646 = vmatpush1.bf16.msra.mxu1 %v1645_v40  ;;  %v1722_v40 = vpack.c.bf16 %v826_v37, %v823_v36 }
 0x17d   :  { %1648 = vmatprep.subr.bf16.mxu1 %v1647_v45  ;;  %v832_v45 = vld [vmem:[#allocation7 + $0x3b8] sm:$0xff] }
 0x17e   :  { %v1725_v49 = vpack.c.bf16 %v832_v45, %v829_v44 }
 0x180   :  { %1650 = vmatpush1.bf16.msra.mxu1 %v1649_v50  ;;  %v833_v50 = vld [vmem:[#allocation7 + $0x3c0] sm:$0xff] }
 0x181   :  { %1652 = vmatprep.subr.bf16.mxu1 %v1651_v56  ;;  %v1669_v56 = vpack.c.bf16 %v836_v51, %v833_v50 }
 0x1f6   :  { %v1246_v57 = vpop.f32.mrb[2].mxu1 }
 0x1f7   :  { %v1247_v58 = vpop.f32.mrb[3].mxu1 }
 0x1f8   :  { %v1248_v59 = vadd.f32 %v1247_v58, %v1246_v57  ;;  %v1728_v57 = vpack.c.bf16 %v838_v53, %v835_v52  ;;  %v839_v58 = vld [vmem:[#allocation7 + $0x3f0] sm:$0xff] }
 0x1fa   :  { %v637_v6 = vadd.f32 %v1248_v59, %v424_v61  ;;  %v1671_v59 = vpack.c.bf16 %v843_v55, %v840_v54  ;;  %v841_v61 = vld [vmem:[#allocation7 + $0x400] sm:$0xff] }
 0x216   :  { %v565_v7 = vpop.f32.mrb[2].mxu0  ;;  %v706_v9 = vpop.f32.mrb[4].mxu1 }
 0x217   :  { %v1739_v11 = vadd.f32 %v565_v7, %v416_v62  ;;  %v1999_v12 = vadd.f32 %v706_v9, %v637_v6  ;;  %v567_v13 = vpop.f32.mrb[3].mxu0  ;;  %v1371_v14 = vpop.f32.mrb[5].mxu1  ;;  %v844_v62 = vld [vmem:[#allocation7 + $0x418] sm:$0xff]  ;;  %v849_v6 = vld [vmem:[#allocation7 + $0x440] sm:$0xff]  ;;  %v1673_v7 = vpack.c.bf16 %v842_v60, %v839_v58 }
 0x218   :  { %v1740_v18 = vadd.f32 %v567_v13, %v420_v5  ;;  %v846_v5 = vld [vmem:[#allocation7 + $0x428] sm:$0xff]  ;;  %v1731_v9 = vpack.c.bf16 %v844_v62, %v841_v61  ;;  %v848_v13 = vld [vmem:[#allocation7 + $0x438] sm:$0xff]  ;;  %v847_v14 = vld [vmem:[#allocation7 + $0x430] sm:$0xff] }
 0x219   :  { %v710_v24 = vmax.f32 %v1739_v11, 0.0  ;;  %v1675_v11 = vpack.c.bf16 %v849_v6, %v846_v5  ;;  %v1734_v63 = vpack.c.bf16 %v850_v15, %v847_v14  ;;  %v712_v27 = vmax.f32 %v1999_v12, 0.0 }
 0x21a   :  { %v711_v20 = vmax.f32 %v1740_v18, 0.0  ;;  %v1677_v18 = vpack.c.bf16 %v848_v13, %v845_v10 }
 0x21c   :  { %938 = vmatprep.mubr.f32.mxu1 %v711_v20  ;;  %1080 = vmatprep.mubr.f32.mxu0 %v711_v20  ;;  %v1679_v20 = vpack.c.bf16 %v855_v17, %v852_v16 }
 0x21d   :  { %939 = vmatmul.mubr.f32.vlgmr.msra.gmra.mrb[6].mxu1 %v710_v24  ;;  %1081 = vmatmul.mubr.f32.vlgmr.msra.gmra.mrb[4].mxu0 %v710_v24 }
 0x21e   :  { %1654 = vmatpush1.bf16.msra.mxu1 %v1653_v21  ;;  %1717 = vmatpush3.bf16.msra.mxu0 %v1716_v22  ;;  %v854_v21 = vld [vmem:[#allocation7 + $0x468] sm:$0xff]  ;;  %v853_v22 = vld [vmem:[#allocation7 + $0x460] sm:$0xff] }
 0x21f   :  { %1656 = vmatprep.subr.bf16.mxu1 %v1655_v25  ;;  %1718 = vmatprep.subr.bf16.mxu0 %v1835_v1  ;;  %v1681_v24 = vpack.c.bf16 %v854_v21, %v851_v19  ;;  %v1737_v25 = vpack.c.bf16 %v856_v23, %v853_v22 }
 0x220   :  { %1009 = vmatprep.mubr.f32.mxu1 %v1834_v0  ;;  %1404 = vmatprep.mubr.msk.f32.mxu0 %vm1836_vm0, %v1834_v0  ;;  %v1667_v0 = vpack.c.bf16 %v837_v47, %v834_v46 }
 0x222   :  { %1658 = vmatpush1.bf16.msra.mxu1 %v1657_v31  ;;  %1720 = vmatpush3.bf16.msra.mxu0 %v1719_v32  ;;  %v870_v31 = vrot.slane %v857_v30, %v1984_v8  ;;  %v862_v32 = vrot.slane %v857_v30, %v1960_v2 }
 0x223   :  { %1660 = vmatprep.subr.bf16.mxu1 %v1659_v34  ;;  %1721 = vmatprep.subr.bf16.mxu0 %v1835_v1 }
 0x226   :  { %1662 = vmatpush1.bf16.msra.mxu1 %v1661_v39  ;;  %1723 = vmatpush3.bf16.msra.mxu0 %v1722_v40 }
 0x227   :  { %1664 = vmatprep.subr.bf16.mxu1 %v1663_v42  ;;  %1724 = vmatprep.subr.bf16.mxu0 %v1835_v1 }
 0x22a   :  { %1666 = vmatpush1.bf16.msra.mxu1 %v1665_v48  ;;  %1726 = vmatpush3.bf16.msra.mxu0 %v1725_v49 }
 0x22b   :  { %1668 = vmatprep.subr.bf16.mxu1 %v1667_v0  ;;  %1727 = vmatprep.subr.bf16.mxu0 %v1835_v1  ;;  %v1185_v0 = vstv %s2033_s0 }
 0x22e   :  { %1670 = vmatpush1.bf16.msra.mxu1 %v1669_v56  ;;  %1729 = vmatpush3.bf16.msra.mxu0 %v1728_v57 }
 0x22f   :  { %1672 = vmatprep.subr.bf16.mxu1 %v1671_v59  ;;  %1730 = vmatprep.subr.bf16.mxu0 %v1835_v1 }
 0x232   :  { %1674 = vmatpush1.bf16.msra.mxu1 %v1673_v7  ;;  %1732 = vmatpush3.bf16.msra.mxu0 %v1731_v9 }
 0x233   :  { %1676 = vmatprep.subr.bf16.mxu1 %v1675_v11  ;;  %1733 = vmatprep.subr.bf16.mxu0 %v1835_v1 }
 0x236   :  { %1678 = vmatpush1.bf16.msra.mxu1 %v1677_v18  ;;  %1735 = vmatpush3.bf16.msra.mxu0 %v1734_v63 }
 0x237   :  { %1680 = vmatprep.subr.bf16.mxu1 %v1679_v20  ;;  %1736 = vmatprep.subr.bf16.mxu0 %v1835_v1  ;;  %v1159_v1 = vld [vmem:[%s2042_s9] sm:$0x7] }
 0x238   :  { %v1164_v37 = vrot.slane %v1159_v1, %v1960_v2  ;;  %v1168_v41 = vrot.slane %v1159_v1, %v1968_v4  ;;  %v1172_v45 = vrot.slane %v1159_v1, %v1984_v8  ;;  %v1184_v2 = vld [vmem:[%s2034_s1] sm:$0xff] }
 0x239   :  { %v1186_v4 = vadd.f32 %v1185_v0, %v1184_v2 }
 0x23a   :  { %1682 = vmatpush1.bf16.msra.mxu1 %v1681_v24  ;;  %1738 = vmatpush3.bf16.msra.mxu0 %v1737_v25 }
 0x23d   :  { %1010 = vmatmul.mubr.f32.vlgmr.msra.gmra.mrb[6].mxu1 %v712_v27  ;;  %1405 = vmatmul.mubr.f32.vlgmr.msra.gmra.mrb[6].mxu0 %v712_v27 }
 0x2f0   :  { %v1298_v28 = vpop.f32.mrb[4].mxu0 }
 0x2f1   :  { %v1299_v29 = vpop.f32.mrb[5].mxu0 }
 0x2f2   :  { %v1300_v3 = vadd.f32 %v1299_v29, %v1298_v28 }
 0x2f4   :  { %v1083_v12 = vadd.f32 %v1300_v3, %v870_v31 }
 0x310   :  { %v1011_v34 = vpop.f32.mrb[6].mxu1  ;;  %v1152_v35 = vpop.f32.mrb[6].mxu0 }
 0x311   :  { %v1741_v36 = vadd.f32 %v1011_v34, %v862_v32  ;;  %v1153_v38 = vadd.f32 %v1152_v35, %v1083_v12  ;;  %v1013_v26 = vpop.f32.mrb[7].mxu1  ;;  %v1406_v39 = vpop.f32.mrb[7].mxu0 }
 0x312   :  { %v1742_v40 = vadd.f32 %v1013_v26, %v866_v33 }
 0x313   :  { %v1156_v42 = vmax.f32 %v1741_v36, 0.0  ;;  %v1158_v43 = vmax.f32 %v1153_v38, 0.0 }
 0x314   :  { %v1157_v44 = vmax.f32 %v1742_v40, 0.0 }
 0x315   :  { %v1176_v46 = vmul.f32 %v1164_v37, %v1156_v42  ;;  %v1178_v48 = vmul.f32 %v1172_v45, %v1158_v43 }
 0x316   :  { %v1177_v47 = vmul.f32 %v1168_v41, %v1157_v44 }
 0x318   :  { %v1179_v49 = vadd.f32 %v1177_v47, %v1176_v46 }
 0x31a   :  { %v1180_v50 = vadd.f32 %v1179_v49, %v1178_v48 }
 0x31c   :  { %1181 = vadd.xlane.f32.xlu0 %v1180_v50 }
 0x3a9   :  { %v1182_v51 = vpop.xlane.xlu0 %1181 }
 0x3aa   :  { %v1187_v52 = vadd.f32 %v1186_v4, %v1182_v51 }
 0x3ac   :  { %v1204_v53 = vmul.f32 -1.442695, %v1187_v52 }
 0x3ae   :  { %1755 = vpow2.f32 %v1204_v53 }
 0x3b8   :  { %v1756_v8 = vpop.eup %1755 }
 0x3b9   :  { %v1191_v54 = vadd.f32 1.0, %v1756_v8 }
 0x3bb   :  { %1757 = vrcp.f32 %v1191_v54 }
 0x3c5   :  { %v1758_v55 = vpop.eup %1757 }
 0x3c6   :  { %1195 = vst.msk [vmem:[%s2043_s10] sm:$0xff] %vm1194_vm2, %v1758_v55 }
 0x3c7   :  { %1200 = vsyncpa [#allocation4], 1 }
 0x3c8   :  { %1201 = vsyncpa [#allocation6], 1 }

</bundles_post_ra>
